<compile_context>
chip_gen: v5e
topology: v5e:2x2
jax: 0.10.0
libtpu: 0.0.40
codegen_flags: <defaults>
</compile_context>

<pallas_src>
import functools
import math

import jax
import jax.numpy as jnp
from jax import lax
from jax.experimental import pallas as pl
from jax.experimental.pallas import tpu as pltpu

HEADS = 8
NUM_BUCKETS = 32
MAX_DISTANCE = 128


def _round_up(x, m):
    return (x + m - 1) // m * m


def _pick_tile(extent, align, max_tile):
    """Largest tile <= max_tile (multiple of `align`) dividing round_up(extent, align)."""
    padded = _round_up(extent, align)
    tile = align
    cand = min(max_tile, padded)
    cand -= cand % align
    while cand >= align:
        if padded % cand == 0:
            tile = cand
            break
        cand -= align
    return tile, padded


def _relpos_bias_kernel(rc_ref, embt_ref, emb_smem_ref, out_ref, *,
                        num_buckets, max_distance, ti, tj):
    heads = out_ref.shape[0]
    i0 = pl.program_id(0) * ti
    j0 = pl.program_id(1) * tj
    off = i0 - j0                     # d(r, c) = max(off + r - c, 0)

    # Whole-tile classification (bias depends only on d = max(i - j, 0)):
    #   all_far : every element has d >= max_distance -> bucket == num_buckets-1
    #   all_zero: every element has i <= j (d == 0)   -> bucket == 0
    all_far = (off - (tj - 1)) >= max_distance
    all_zero = (off + (ti - 1)) <= 0

    @pl.when(all_far)
    def _():
        for h in range(heads):
            out_ref[h] = jnp.full((ti, tj), emb_smem_ref[h, num_buckets - 1],
                                  dtype=out_ref.dtype)

    @pl.when(all_zero)
    def _():
        for h in range(heads):
            out_ref[h] = jnp.full((ti, tj), emb_smem_ref[h, 0],
                                  dtype=out_ref.dtype)

    @pl.when(jnp.logical_not(jnp.logical_or(all_far, all_zero)))
    def _():
        # rc_ref holds the flat lane-major (r - c) pattern of a (ti, tj) tile.
        d = jnp.maximum(rc_ref[...] + off, 0)                 # (1, ti*tj) int32
        max_exact = num_buckets // 2
        is_small = d < max_exact
        d_safe = jnp.maximum(d, 1).astype(jnp.float32)        # avoid log(0); masked anyway
        val_if_large = max_exact + (
            jnp.log(d_safe / max_exact)
            / math.log(max_distance / max_exact)
            * (num_buckets - max_exact)
        ).astype(jnp.int32)                                   # trunc, same as torch .long()
        val_if_large = jnp.minimum(val_if_large, num_buckets - 1)
        bucket = jnp.where(is_small, d, val_if_large)         # (1, ti*tj)

        # Embedding gather as a one-hot matmul on the MXU (exact: 0/1 x f32).
        b_iota = lax.broadcasted_iota(jnp.int32, (num_buckets, ti * tj), 0)
        onehot = (b_iota == bucket).astype(jnp.float32)       # (B, ti*tj)
        vals = jnp.dot(embt_ref[...], onehot,
                       precision=lax.Precision.HIGHEST,
                       preferred_element_type=jnp.float32)    # (H, ti*tj)
        out_ref[...] = vals.reshape(out_ref.shape)


def rel_pos_bias(emb, i, j, *, max_distance=MAX_DISTANCE,
                 max_rows_per_tile=64, max_cols_per_tile=512):
    """emb: (num_buckets, heads) float32 -> (heads, i, j) float32."""
    num_buckets, heads = emb.shape
    emb_t = jnp.asarray(emb, jnp.float32).T                   # (heads, num_buckets), hoisted

    ti, i_pad = _pick_tile(i, 8, max_rows_per_tile)
    tj, j_pad = _pick_tile(j, 128, max_cols_per_tile)         # lane-dense stores
    grid = (i_pad // ti, j_pad // tj)

    # Grid-invariant (r - c) pattern, already flat lane-major.
    rc = (jnp.arange(ti, dtype=jnp.int32)[:, None]
          - jnp.arange(tj, dtype=jnp.int32)[None, :]).reshape(1, ti * tj)

    kernel = functools.partial(
        _relpos_bias_kernel, num_buckets=num_buckets,
        max_distance=max_distance, ti=ti, tj=tj)

    out = pl.pallas_call(
        kernel,
        out_shape=jax.ShapeDtypeStruct((heads, i_pad, j_pad), jnp.float32),
        grid=grid,
        in_specs=[
            pl.BlockSpec((1, ti * tj), lambda bi, bj: (0, 0)),          # rc (resident)
            pl.BlockSpec((heads, num_buckets), lambda bi, bj: (0, 0)),  # emb^T (resident)
            pl.BlockSpec(memory_space=pltpu.MemorySpace.SMEM),          # emb^T scalars
        ],
        out_specs=pl.BlockSpec((heads, ti, tj), lambda bi, bj: (0, bi, bj)),
        compiler_params=pltpu.CompilerParams(
            dimension_semantics=("parallel", "parallel"),
            vmem_limit_bytes=32 * 1024 * 1024),
        cost_estimate=pl.CostEstimate(
            flops=2 * heads * num_buckets * i_pad * j_pad,
            transcendentals=i_pad * j_pad,
            bytes_accessed=4 * heads * i_pad * j_pad
                           + 4 * ti * tj + 8 * heads * num_buckets),
    )(rc, emb_t, emb_t)

    if (i_pad, j_pad) != (i, j):
        out = out[:, :i, :j]
    return out


def _rel_pos_bias_ref(emb, i, j, *, num_buckets=NUM_BUCKETS, max_distance=MAX_DISTANCE):
    """Pure-JAX reference matching the torch module."""
    q_pos = jnp.arange(i, dtype=jnp.int32)
    k_pos = jnp.arange(j, dtype=jnp.int32)
    rel = k_pos[None, :] - q_pos[:, None]
    n = jnp.maximum(-rel, 0)
    max_exact = num_buckets // 2
    is_small = n < max_exact
    val_if_large = max_exact + (
        jnp.log(jnp.maximum(n, 1).astype(jnp.float32) / max_exact)
        / math.log(max_distance / max_exact)
        * (num_buckets - max_exact)
    ).astype(jnp.int32)
    val_if_large = jnp.minimum(val_if_large, num_buckets - 1)
    bucket = jnp.where(is_small, n, val_if_large)
    values = jnp.take(emb, bucket, axis=0)          # (i, j, h)
    return jnp.transpose(values, (2, 0, 1))         # (h, i, j)


if __name__ == "__main__":
    key = jax.random.PRNGKey(0)
    # Deterministic init of nn.Embedding(num_buckets, heads).weight
    emb = jax.random.normal(key, (NUM_BUCKETS, HEADS), dtype=jnp.float32)

    # Small case, a non-aligned padded case, and a case large enough to
    # exercise the tiled grid and all three per-tile code paths
    # (above-diagonal constant, in-band one-hot gather, far-below constant).
    for (i, j) in [(8, 8), (100, 200), (1024, 640)]:
        out = jax.block_until_ready(rel_pos_bias(emb, i, j))
        ref = _rel_pos_bias_ref(emb, i, j)
        assert out.shape == (HEADS, i, j)
        # Gather is exact (0/1 one-hot x f32 emb, HIGHEST precision); loose
        # bound is only a guard, logic bugs would show up as O(1) errors.
        max_err = float(jnp.max(jnp.abs(out - ref)))
        assert jnp.allclose(out, ref, atol=1e-2, rtol=1e-2), (i, j, max_err)

    print("KERNEL_OK")
</pallas_src>

<mosaic_0001>
module attributes {stable_mosaic.version = 11 : i64} {
  func.func @_relpos_bias_kernel(%arg0: i32, %arg1: i32, %arg2: memref<1x1024xi32, #tpu.memory_space<vmem>>, %arg3: memref<8x32xf32, #tpu.memory_space<vmem>>, %arg4: memref<8x32xf32, #tpu.memory_space<smem>>, %arg5: memref<8x8x128xf32, #tpu.memory_space<vmem>>) attributes {dimension_semantics = [#tpu.dimension_semantics<parallel>, #tpu.dimension_semantics<parallel>], iteration_bounds = array<i64: 1, 1>, scalar_prefetch = 0 : i64, scratch_operands = 0 : i64, tpu.core_type = #tpu.core_type<tc>, window_params = [{pipeline_mode = #tpu.pipeline_mode<synchronous>, transform_indices = @transform_0, window_bounds = array<i64: 1, 1024>}, {pipeline_mode = #tpu.pipeline_mode<synchronous>, transform_indices = @transform_1, window_bounds = array<i64: 8, 32>}, {transform_indices = @transform_2, window_bounds = array<i64: 8, 32>}, {transform_indices = @transform_3, window_bounds = array<i64: 8, 8, 128>}]} {
    %c8_i32 = arith.constant 8 : i32
    %0 = arith.muli %arg0, %c8_i32 : i32
    %c128_i32 = arith.constant 128 : i32
    %1 = arith.muli %arg1, %c128_i32 : i32
    %2 = arith.subi %0, %1 : i32
    %c127_i32 = arith.constant 127 : i32
    %3 = arith.subi %2, %c127_i32 : i32
    %c128_i32_0 = arith.constant 128 : i32
    %4 = arith.cmpi sge, %3, %c128_i32_0 : i32
    %c7_i32 = arith.constant 7 : i32
    %5 = arith.addi %2, %c7_i32 : i32
    %c0_i32 = arith.constant 0 : i32
    %6 = arith.cmpi sle, %5, %c0_i32 : i32
    %7 = arith.extui %4 : i1 to i32
    %c0_i32_1 = arith.constant 0 : i32
    %8 = arith.cmpi ne, %7, %c0_i32_1 : i32
    scf.if %8 {
      %c0 = arith.constant 0 : index
      %c31 = arith.constant 31 : index
      %15 = memref.load %arg4[%c0, %c31] : memref<8x32xf32, #tpu.memory_space<smem>>
      %16 = vector.broadcast %15 : f32 to vector<8x128xf32>
      %c0_4 = arith.constant 0 : index
      %c0_5 = arith.constant 0 : index
      %c0_6 = arith.constant 0 : index
      %17 = vector.load %arg5[%c0_4, %c0_5, %c0_6] : memref<8x8x128xf32, #tpu.memory_space<vmem>>, vector<1x8x128xf32>
      %18 = vector.shape_cast %17 : vector<1x8x128xf32> to vector<8x128xf32>
      %19 = vector.shape_cast %16 : vector<8x128xf32> to vector<1x8x128xf32>
      tpu.vector_store %arg5[%c0_4, %c0_5, %c0_6], %19 {strides = array<i32>} : memref<8x8x128xf32, #tpu.memory_space<vmem>>, vector<1x8x128xf32>,
      %c1 = arith.constant 1 : index
      %c31_7 = arith.constant 31 : index
      %20 = memref.load %arg4[%c1, %c31_7] : memref<8x32xf32, #tpu.memory_space<smem>>
      %21 = vector.broadcast %20 : f32 to vector<8x128xf32>
      %c1_8 = arith.constant 1 : index
      %c0_9 = arith.constant 0 : index
      %c0_10 = arith.constant 0 : index
      %22 = vector.load %arg5[%c1_8, %c0_9, %c0_10] : memref<8x8x128xf32, #tpu.memory_space<vmem>>, vector<1x8x128xf32>
      %23 = vector.shape_cast %22 : vector<1x8x128xf32> to vector<8x128xf32>
      %24 = vector.shape_cast %21 : vector<8x128xf32> to vector<1x8x128xf32>
      tpu.vector_store %arg5[%c1_8, %c0_9, %c0_10], %24 {strides = array<i32>} : memref<8x8x128xf32, #tpu.memory_space<vmem>>, vector<1x8x128xf32>,
      %c2 = arith.constant 2 : index
      %c31_11 = arith.constant 31 : index
      %25 = memref.load %arg4[%c2, %c31_11] : memref<8x32xf32, #tpu.memory_space<smem>>
      %26 = vector.broadcast %25 : f32 to vector<8x128xf32>
      %c2_12 = arith.constant 2 : index
      %c0_13 = arith.constant 0 : index
      %c0_14 = arith.constant 0 : index
      %27 = vector.load %arg5[%c2_12, %c0_13, %c0_14] : memref<8x8x128xf32, #tpu.memory_space<vmem>>, vector<1x8x128xf32>
      %28 = vector.shape_cast %27 : vector<1x8x128xf32> to vector<8x128xf32>
      %29 = vector.shape_cast %26 : vector<8x128xf32> to vector<1x8x128xf32>
      tpu.vector_store %arg5[%c2_12, %c0_13, %c0_14], %29 {strides = array<i32>} : memref<8x8x128xf32, #tpu.memory_space<vmem>>, vector<1x8x128xf32>,
      %c3 = arith.constant 3 : index
      %c31_15 = arith.constant 31 : index
      %30 = memref.load %arg4[%c3, %c31_15] : memref<8x32xf32, #tpu.memory_space<smem>>
      %31 = vector.broadcast %30 : f32 to vector<8x128xf32>
      %c3_16 = arith.constant 3 : index
      %c0_17 = arith.constant 0 : index
      %c0_18 = arith.constant 0 : index
      %32 = vector.load %arg5[%c3_16, %c0_17, %c0_18] : memref<8x8x128xf32, #tpu.memory_space<vmem>>, vector<1x8x128xf32>
      %33 = vector.shape_cast %32 : vector<1x8x128xf32> to vector<8x128xf32>
      %34 = vector.shape_cast %31 : vector<8x128xf32> to vector<1x8x128xf32>
      tpu.vector_store %arg5[%c3_16, %c0_17, %c0_18], %34 {strides = array<i32>} : memref<8x8x128xf32, #tpu.memory_space<vmem>>, vector<1x8x128xf32>,
      %c4 = arith.constant 4 : index
      %c31_19 = arith.constant 31 : index
      %35 = memref.load %arg4[%c4, %c31_19] : memref<8x32xf32, #tpu.memory_space<smem>>
      %36 = vector.broadcast %35 : f32 to vector<8x128xf32>
      %c4_20 = arith.constant 4 : index
      %c0_21 = arith.constant 0 : index
      %c0_22 = arith.constant 0 : index
      %37 = vector.load %arg5[%c4_20, %c0_21, %c0_22] : memref<8x8x128xf32, #tpu.memory_space<vmem>>, vector<1x8x128xf32>
      %38 = vector.shape_cast %37 : vector<1x8x128xf32> to vector<8x128xf32>
      %39 = vector.shape_cast %36 : vector<8x128xf32> to vector<1x8x128xf32>
      tpu.vector_store %arg5[%c4_20, %c0_21, %c0_22], %39 {strides = array<i32>} : memref<8x8x128xf32, #tpu.memory_space<vmem>>, vector<1x8x128xf32>,
      %c5 = arith.constant 5 : index
      %c31_23 = arith.constant 31 : index
      %40 = memref.load %arg4[%c5, %c31_23] : memref<8x32xf32, #tpu.memory_space<smem>>
      %41 = vector.broadcast %40 : f32 to vector<8x128xf32>
      %c5_24 = arith.constant 5 : index
      %c0_25 = arith.constant 0 : index
      %c0_26 = arith.constant 0 : index
      %42 = vector.load %arg5[%c5_24, %c0_25, %c0_26] : memref<8x8x128xf32, #tpu.memory_space<vmem>>, vector<1x8x128xf32>
      %43 = vector.shape_cast %42 : vector<1x8x128xf32> to vector<8x128xf32>
      %44 = vector.shape_cast %41 : vector<8x128xf32> to vector<1x8x128xf32>
      tpu.vector_store %arg5[%c5_24, %c0_25, %c0_26], %44 {strides = array<i32>} : memref<8x8x128xf32, #tpu.memory_space<vmem>>, vector<1x8x128xf32>,
      %c6 = arith.constant 6 : index
      %c31_27 = arith.constant 31 : index
      %45 = memref.load %arg4[%c6, %c31_27] : memref<8x32xf32, #tpu.memory_space<smem>>
      %46 = vector.broadcast %45 : f32 to vector<8x128xf32>
      %c6_28 = arith.constant 6 : index
      %c0_29 = arith.constant 0 : index
      %c0_30 = arith.constant 0 : index
      %47 = vector.load %arg5[%c6_28, %c0_29, %c0_30] : memref<8x8x128xf32, #tpu.memory_space<vmem>>, vector<1x8x128xf32>
      %48 = vector.shape_cast %47 : vector<1x8x128xf32> to vector<8x128xf32>
      %49 = vector.shape_cast %46 : vector<8x128xf32> to vector<1x8x128xf32>
      tpu.vector_store %arg5[%c6_28, %c0_29, %c0_30], %49 {strides = array<i32>} : memref<8x8x128xf32, #tpu.memory_space<vmem>>, vector<1x8x128xf32>,
      %c7 = arith.constant 7 : index
      %c31_31 = arith.constant 31 : index
      %50 = memref.load %arg4[%c7, %c31_31] : memref<8x32xf32, #tpu.memory_space<smem>>
      %51 = vector.broadcast %50 : f32 to vector<8x128xf32>
      %c7_32 = arith.constant 7 : index
      %c0_33 = arith.constant 0 : index
      %c0_34 = arith.constant 0 : index
      %52 = vector.load %arg5[%c7_32, %c0_33, %c0_34] : memref<8x8x128xf32, #tpu.memory_space<vmem>>, vector<1x8x128xf32>
      %53 = vector.shape_cast %52 : vector<1x8x128xf32> to vector<8x128xf32>
      %54 = vector.shape_cast %51 : vector<8x128xf32> to vector<1x8x128xf32>
      tpu.vector_store %arg5[%c7_32, %c0_33, %c0_34], %54 {strides = array<i32>} : memref<8x8x128xf32, #tpu.memory_space<vmem>>, vector<1x8x128xf32>,
    } else {
    }
    %9 = arith.extui %6 : i1 to i32
    %c0_i32_2 = arith.constant 0 : i32
    %10 = arith.cmpi ne, %9, %c0_i32_2 : i32
    scf.if %10 {
      %c0 = arith.constant 0 : index
      %c0_4 = arith.constant 0 : index
      %15 = memref.load %arg4[%c0, %c0_4] : memref<8x32xf32, #tpu.memory_space<smem>>
      %16 = vector.broadcast %15 : f32 to vector<8x128xf32>
      %c0_5 = arith.constant 0 : index
      %c0_6 = arith.constant 0 : index
      %c0_7 = arith.constant 0 : index
      %17 = vector.load %arg5[%c0_5, %c0_6, %c0_7] : memref<8x8x128xf32, #tpu.memory_space<vmem>>, vector<1x8x128xf32>
      %18 = vector.shape_cast %17 : vector<1x8x128xf32> to vector<8x128xf32>
      %19 = vector.shape_cast %16 : vector<8x128xf32> to vector<1x8x128xf32>
      tpu.vector_store %arg5[%c0_5, %c0_6, %c0_7], %19 {strides = array<i32>} : memref<8x8x128xf32, #tpu.memory_space<vmem>>, vector<1x8x128xf32>,
      %c1 = arith.constant 1 : index
      %c0_8 = arith.constant 0 : index
      %20 = memref.load %arg4[%c1, %c0_8] : memref<8x32xf32, #tpu.memory_space<smem>>
      %21 = vector.broadcast %20 : f32 to vector<8x128xf32>
      %c1_9 = arith.constant 1 : index
      %c0_10 = arith.constant 0 : index
      %c0_11 = arith.constant 0 : index
      %22 = vector.load %arg5[%c1_9, %c0_10, %c0_11] : memref<8x8x128xf32, #tpu.memory_space<vmem>>, vector<1x8x128xf32>
      %23 = vector.shape_cast %22 : vector<1x8x128xf32> to vector<8x128xf32>
      %24 = vector.shape_cast %21 : vector<8x128xf32> to vector<1x8x128xf32>
      tpu.vector_store %arg5[%c1_9, %c0_10, %c0_11], %24 {strides = array<i32>} : memref<8x8x128xf32, #tpu.memory_space<vmem>>, vector<1x8x128xf32>,
      %c2 = arith.constant 2 : index
      %c0_12 = arith.constant 0 : index
      %25 = memref.load %arg4[%c2, %c0_12] : memref<8x32xf32, #tpu.memory_space<smem>>
      %26 = vector.broadcast %25 : f32 to vector<8x128xf32>
      %c2_13 = arith.constant 2 : index
      %c0_14 = arith.constant 0 : index
      %c0_15 = arith.constant 0 : index
      %27 = vector.load %arg5[%c2_13, %c0_14, %c0_15] : memref<8x8x128xf32, #tpu.memory_space<vmem>>, vector<1x8x128xf32>
      %28 = vector.shape_cast %27 : vector<1x8x128xf32> to vector<8x128xf32>
      %29 = vector.shape_cast %26 : vector<8x128xf32> to vector<1x8x128xf32>
      tpu.vector_store %arg5[%c2_13, %c0_14, %c0_15], %29 {strides = array<i32>} : memref<8x8x128xf32, #tpu.memory_space<vmem>>, vector<1x8x128xf32>,
      %c3 = arith.constant 3 : index
      %c0_16 = arith.constant 0 : index
      %30 = memref.load %arg4[%c3, %c0_16] : memref<8x32xf32, #tpu.memory_space<smem>>
      %31 = vector.broadcast %30 : f32 to vector<8x128xf32>
      %c3_17 = arith.constant 3 : index
      %c0_18 = arith.constant 0 : index
      %c0_19 = arith.constant 0 : index
      %32 = vector.load %arg5[%c3_17, %c0_18, %c0_19] : memref<8x8x128xf32, #tpu.memory_space<vmem>>, vector<1x8x128xf32>
      %33 = vector.shape_cast %32 : vector<1x8x128xf32> to vector<8x128xf32>
      %34 = vector.shape_cast %31 : vector<8x128xf32> to vector<1x8x128xf32>
      tpu.vector_store %arg5[%c3_17, %c0_18, %c0_19], %34 {strides = array<i32>} : memref<8x8x128xf32, #tpu.memory_space<vmem>>, vector<1x8x128xf32>,
      %c4 = arith.constant 4 : index
      %c0_20 = arith.constant 0 : index
      %35 = memref.load %arg4[%c4, %c0_20] : memref<8x32xf32, #tpu.memory_space<smem>>
      %36 = vector.broadcast %35 : f32 to vector<8x128xf32>
      %c4_21 = arith.constant 4 : index
      %c0_22 = arith.constant 0 : index
      %c0_23 = arith.constant 0 : index
      %37 = vector.load %arg5[%c4_21, %c0_22, %c0_23] : memref<8x8x128xf32, #tpu.memory_space<vmem>>, vector<1x8x128xf32>
      %38 = vector.shape_cast %37 : vector<1x8x128xf32> to vector<8x128xf32>
      %39 = vector.shape_cast %36 : vector<8x128xf32> to vector<1x8x128xf32>
      tpu.vector_store %arg5[%c4_21, %c0_22, %c0_23], %39 {strides = array<i32>} : memref<8x8x128xf32, #tpu.memory_space<vmem>>, vector<1x8x128xf32>,
      %c5 = arith.constant 5 : index
      %c0_24 = arith.constant 0 : index
      %40 = memref.load %arg4[%c5, %c0_24] : memref<8x32xf32, #tpu.memory_space<smem>>
      %41 = vector.broadcast %40 : f32 to vector<8x128xf32>
      %c5_25 = arith.constant 5 : index
      %c0_26 = arith.constant 0 : index
      %c0_27 = arith.constant 0 : index
      %42 = vector.load %arg5[%c5_25, %c0_26, %c0_27] : memref<8x8x128xf32, #tpu.memory_space<vmem>>, vector<1x8x128xf32>
      %43 = vector.shape_cast %42 : vector<1x8x128xf32> to vector<8x128xf32>
      %44 = vector.shape_cast %41 : vector<8x128xf32> to vector<1x8x128xf32>
      tpu.vector_store %arg5[%c5_25, %c0_26, %c0_27], %44 {strides = array<i32>} : memref<8x8x128xf32, #tpu.memory_space<vmem>>, vector<1x8x128xf32>,
      %c6 = arith.constant 6 : index
      %c0_28 = arith.constant 0 : index
      %45 = memref.load %arg4[%c6, %c0_28] : memref<8x32xf32, #tpu.memory_space<smem>>
      %46 = vector.broadcast %45 : f32 to vector<8x128xf32>
      %c6_29 = arith.constant 6 : index
      %c0_30 = arith.constant 0 : index
      %c0_31 = arith.constant 0 : index
      %47 = vector.load %arg5[%c6_29, %c0_30, %c0_31] : memref<8x8x128xf32, #tpu.memory_space<vmem>>, vector<1x8x128xf32>
      %48 = vector.shape_cast %47 : vector<1x8x128xf32> to vector<8x128xf32>
      %49 = vector.shape_cast %46 : vector<8x128xf32> to vector<1x8x128xf32>
      tpu.vector_store %arg5[%c6_29, %c0_30, %c0_31], %49 {strides = array<i32>} : memref<8x8x128xf32, #tpu.memory_space<vmem>>, vector<1x8x128xf32>,
      %c7 = arith.constant 7 : index
      %c0_32 = arith.constant 0 : index
      %50 = memref.load %arg4[%c7, %c0_32] : memref<8x32xf32, #tpu.memory_space<smem>>
      %51 = vector.broadcast %50 : f32 to vector<8x128xf32>
      %c7_33 = arith.constant 7 : index
      %c0_34 = arith.constant 0 : index
      %c0_35 = arith.constant 0 : index
      %52 = vector.load %arg5[%c7_33, %c0_34, %c0_35] : memref<8x8x128xf32, #tpu.memory_space<vmem>>, vector<1x8x128xf32>
      %53 = vector.shape_cast %52 : vector<1x8x128xf32> to vector<8x128xf32>
      %54 = vector.shape_cast %51 : vector<8x128xf32> to vector<1x8x128xf32>
      tpu.vector_store %arg5[%c7_33, %c0_34, %c0_35], %54 {strides = array<i32>} : memref<8x8x128xf32, #tpu.memory_space<vmem>>, vector<1x8x128xf32>,
    } else {
    }
    %11 = arith.ori %4, %6 : i1
    %true = arith.constant true
    %12 = arith.xori %11, %true : i1
    %13 = arith.extui %12 : i1 to i32
    %c0_i32_3 = arith.constant 0 : i32
    %14 = arith.cmpi ne, %13, %c0_i32_3 : i32
    scf.if %14 {
      %c0 = arith.constant 0 : index
      %c0_4 = arith.constant 0 : index
      %15 = vector.load %arg2[%c0, %c0_4] : memref<1x1024xi32, #tpu.memory_space<vmem>>, vector<1x1024xi32>
      %16 = vector.broadcast %2 : i32 to vector<1x1024xi32>
      %17 = arith.addi %15, %16 : vector<1x1024xi32>
      %c0_i32_5 = arith.constant 0 : i32
      %18 = vector.broadcast %c0_i32_5 : i32 to vector<1x1024xi32>
      %19 = arith.maxsi %17, %18 : vector<1x1024xi32>
      %c16_i32 = arith.constant 16 : i32
      %20 = vector.broadcast %c16_i32 : i32 to vector<1x1024xi32>
      %21 = arith.cmpi slt, %19, %20 : vector<1x1024xi32>
      %c1_i32 = arith.constant 1 : i32
      %22 = vector.broadcast %c1_i32 : i32 to vector<1x1024xi32>
      %23 = arith.maxsi %19, %22 : vector<1x1024xi32>
      %24 = arith.sitofp %23 : vector<1x1024xi32> to vector<1x1024xf32>
      %cst = arith.constant 1.600000e+01 : f32
      %25 = vector.broadcast %cst : f32 to vector<1x1024xf32>
      %26 = arith.divf %24, %25 : vector<1x1024xf32>
      %27 = math.log %26 : vector<1x1024xf32>
      %cst_6 = arith.constant 2.07944155 : f32
      %28 = vector.broadcast %cst_6 : f32 to vector<1x1024xf32>
      %29 = arith.divf %27, %28 : vector<1x1024xf32>
      %cst_7 = arith.constant 1.600000e+01 : f32
      %30 = vector.broadcast %cst_7 : f32 to vector<1x1024xf32>
      %31 = arith.mulf %29, %30 : vector<1x1024xf32>
      %32 = arith.fptosi %31 : vector<1x1024xf32> to vector<1x1024xi32>
      %c16_i32_8 = arith.constant 16 : i32
      %33 = vector.broadcast %c16_i32_8 : i32 to vector<1x1024xi32>
      %34 = arith.addi %33, %32 : vector<1x1024xi32>
      %c31_i32 = arith.constant 31 : i32
      %35 = vector.broadcast %c31_i32 : i32 to vector<1x1024xi32>
      %36 = arith.minsi %34, %35 : vector<1x1024xi32>
      %37 = arith.select %21, %19, %36 : vector<1x1024xi1>, vector<1x1024xi32>
      %38 = tpu.iota {dimensions = array<i32: 0>} : vector<32x1024xi32>
      %39 = vector.broadcast %37 : vector<1x1024xi32> to vector<32x1024xi32>
      %40 = arith.cmpi eq, %38, %39 : vector<32x1024xi32>
      %41 = arith.extui %40 : vector<32x1024xi1> to vector<32x1024xi32>
      %42 = arith.sitofp %41 : vector<32x1024xi32> to vector<32x1024xf32>
      %c0_9 = arith.constant 0 : index
      %c0_10 = arith.constant 0 : index
      %43 = vector.load %arg3[%c0_9, %c0_10] : memref<8x32xf32, #tpu.memory_space<vmem>>, vector<8x32xf32>
      %cst_11 = arith.constant dense<0.000000e+00> : vector<8x1024xf32>
      %44 = tpu.matmul %43, %42, %cst_11 {dimension_numbers = #tpu.dot_dimension_numbers<[1], [0], [0], [1], [0, 0, 1, 1], [], []>, precision = #tpu.contract_precision<fp32>} : vector<8x32xf32>, vector<32x1024xf32>, vector<8x1024xf32> -> vector<8x1024xf32>
      %45 = vector.shape_cast %44 : vector<8x1024xf32> to vector<8x8x128xf32>
      %c0_12 = arith.constant 0 : index
      %c0_13 = arith.constant 0 : index
      %c0_14 = arith.constant 0 : index
      %46 = vector.load %arg5[%c0_12, %c0_13, %c0_14] : memref<8x8x128xf32, #tpu.memory_space<vmem>>, vector<8x8x128xf32>
      tpu.vector_store %arg5[%c0_12, %c0_13, %c0_14], %45 {strides = array<i32>} : memref<8x8x128xf32, #tpu.memory_space<vmem>>, vector<8x8x128xf32>,
    } else {
    }
    return
  }
  func.func @transform_0(%arg0: i32, %arg1: i32) -> (i32, i32) {
    %c0_i32 = arith.constant 0 : i32
    %c0_i32_0 = arith.constant 0 : i32
    %c0_i32_1 = arith.constant 0 : i32
    return %c0_i32, %c0_i32_0 : i32, i32
  }
  func.func @transform_1(%arg0: i32, %arg1: i32) -> (i32, i32) {
    %c0_i32 = arith.constant 0 : i32
    %c0_i32_0 = arith.constant 0 : i32
    %c0_i32_1 = arith.constant 0 : i32
    return %c0_i32, %c0_i32_0 : i32, i32
  }
  func.func @transform_2(%arg0: i32, %arg1: i32) -> (i32, i32) {
    %c0_i32 = arith.constant 0 : i32
    %c0_i32_0 = arith.constant 0 : i32
    %c0_i32_1 = arith.constant 0 : i32
    return %c0_i32, %c0_i32_0 : i32, i32
  }
  func.func @transform_3(%arg0: i32, %arg1: i32) -> (i32, i32, i32) {
    %c0_i32 = arith.constant 0 : i32
    %c0_i32_0 = arith.constant 0 : i32
    return %c0_i32, %arg0, %arg1 : i32, i32, i32
  }
}

</mosaic_0001>

<bundles_post_ra>
// kernel: tpu_custom_call.1
= control target key start
LH: loop header
LB: loop body
LE: loop exit
PB: predicated region body
PF: predicated region fallthrough
CT: control target
= control target key end

     0   :  { %8 = vsyncpa [#allocation3], 0  ;;  %s2993_s0 = inlined_call_operand.hbm [shape: s32[1,1024], index: 0, kind: input, shape index: {}]   ;;  %s2994_s1 = inlined_call_operand.hbm [shape: f32[8,32], index: 1, kind: input, shape index: {}]   ;;  %s2995_s2 = inlined_call_operand.hbm [shape: f32[8,32], index: 2, kind: input, shape index: {}]   ;;  %s2996_s3 = inlined_call_operand.hbm [shape: f32[8,8,128], index: 3, kind: output, shape index: {}]  }
   0x1   :  { %9 = vsyncpa [#allocation7], 0 }
   0x2   :  { %10 = vsyncpa [#allocation5], 0 }
   0x3   :  { %11 = vsyncpa [#allocation4], 0  ;;  %s17_s14 = sshll.u32 %s2993_s0, 4  ;;  %s2070_s15 = smov [#allocation2]   ;;  %s18_s14 = int_to_ptr.hbm [resolvable:$true] %s17_s14 }
   0x4   :  { %s19_s16 = sshll.u32 %s2070_s15, 4  ;;  %s28_s19 = sshll.u32 %s2994_s1, 4  ;;  %s20_s16 = int_to_ptr.vmem [resolvable:$true] %s19_s16  ;;  %s29_s19 = int_to_ptr.hbm [resolvable:$true] %s28_s19 }
   0x5   :  { %22 = dma.hbm_to_vmem [thread:$0]  %s18_s14, 128, %s20_s16, [#allocation3]  }
   0x6   :  { %s2071_s20 = smov [#allocation6]   ;;  %s39_s24 = sshll.u32 %s2995_s2, 4  ;;  %s40_s24 = int_to_ptr.hbm [resolvable:$true] %s39_s24 }
   0x7   :  { %s30_s21 = sshll.u32 %s2071_s20, 4  ;;  %s2072_s0 = smov [#allocation8]   ;;  %s31_s21 = int_to_ptr.vmem [resolvable:$true] %s30_s21 }
   0x8   :  { %33 = dma.hbm_to_vmem [thread:$0]  %s29_s19, 128, %s31_s21, [#allocation7]  }
   0x9   :  { %42 = dma.hbm_to_smem %s40_s24, 128, %s2072_s0, [#allocation5]  }
   0xa   :  { %2062 = dma.done.wait [#allocation3], 128  }
   0xb   :  { %2063 = vsyncadd [#allocation3], 4294967168 }
   0xc   :  { %2064 = dma.done.wait [#allocation7], 128  }
   0xd   :  { %2065 = vsyncadd [#allocation7], 4294967168 }
   0xe   :  { %2066 = dma.done.wait [#allocation5], 128  }
   0xf   :  { %2067 = vsyncadd [#allocation5], 4294967168 }
  0x10   :  { %55 = sfence }
  0x11   :  { %v135_v0 = vld [vmem:[#allocation2] sm:$0xff]  ;;  %v2073_v1 = vmov 16.0   ;;  %v2074_v2 = vmov 2.0794415   ;;  %v277_v20 = vld [vmem:[#allocation6] sm:$0xff]  ;;  %vm278_vm4 = vcmask 261120   ;;  %v168_v28 = vlaneseq }
  0x12   :  { %vm138_vm0 = vcmp.gt.s32.totalorder %v135_v0, 0  ;;  %1972 = vrcp.f32 %v2073_v1  ;;  %v280_v23 = vsel %vm278_vm4, %v277_v20, 0  ;;  %v2075_v43 = vmov 1.0   ;;  %s2077_s1 = smov [#allocation9]   ;;  %s1799_s27 = sshll.u32 %s2996_s3, 4  ;;  %s1800_s27 = int_to_ptr.hbm [resolvable:$true] %s1799_s27 }
  0x13   :  { %1974 = vrcp.f32 %v2074_v2  ;;  %v139_v3 = vsel %vm138_vm0, %v135_v0, 0  ;;  %v2109_v25 = vand.u32 4294901760, %v280_v23  ;;  %v2114_v32 = vshrl.u32 %v168_v28, 7  ;;  %s1797_s2 = sshll.u32 %s2077_s1, 4  ;;  %s2078_s28 = smov 128   ;;  %s1798_s2 = int_to_ptr.vmem [resolvable:$true] %s1797_s2 }
  0x14   :  { %vm141_vm1 = vcmp.gt.s32.totalorder %v139_v3, 1  ;;  %vm140_vm6 = vcmp.lt.s32.totalorder %v139_v3, 16  ;;  %v2076_v44 = vmov 0.0   ;;  %s2079_s29 = smov 8  }
  0x15   :  { %v142_v8 = vsel %vm141_vm1, %v139_v3, 1  ;;  %v2112_v31 = vsub.f32 %v280_v23, %v2109_v25  ;;  %v2120_v36 = vadd.s32 24, %v2114_v32  ;;  %v2123_v37 = vadd.s32 16, %v2114_v32 }
  0x16   :  { %v143_v11 = vcvt.s32.f32 %v142_v8  ;;  %v2126_v38 = vadd.s32 8, %v2114_v32 }
  0x17   :  { %v2117_v34 = vand.u32 4294901760, %v2112_v31 }
  0x18   :  { %v1973_v4 = vpop.eup %1972 }
  0x19   :  { %v1975_v5 = vpop.eup %1974  ;;  %v145_v6 = vmul.f32 16.0, %v1973_v4  ;;  %vm149_vm2 = vweird.f32 %v1973_v4  ;;  %v305_v41 = vsub.f32 %v2112_v31, %v2117_v34 }
  0x1a   :  { %v155_v7 = vmul.f32 2.0794415, %v1975_v5  ;;  %vm159_vm3 = vweird.f32 %v1975_v5 }
  0x1b   :  { %v146_v9 = vsub.f32 1.0, %v145_v6  ;;  %v2178_v53 = vand.u32 4294901760, %v305_v41 }
  0x1c   :  { %v156_v12 = vsub.f32 1.0, %v155_v7 }
  0x1d   :  { %v147_v10 = vmul.f32 %v1973_v4, %v146_v9 }
  0x1e   :  { %v157_v16 = vmul.f32 %v1975_v5, %v156_v12 }
  0x1f   :  { %v148_v13 = vadd.f32 %v1973_v4, %v147_v10 }
  0x20   :  { %v158_v17 = vadd.f32 %v1975_v5, %v157_v16 }
  0x21   :  { %v150_v14 = vsel %vm149_vm2, %v1973_v4, %v148_v13 }
  0x22   :  { %v151_v15 = vmul.f32 %v150_v14, %v143_v11  ;;  %v160_v19 = vsel %vm159_vm3, %v1975_v5, %v158_v17 }
  0x24   :  { %1976 = vlog2.f32 %v151_v15 }
  0x2a   :  { %v1977_v18 = vpop.eup %1976 }
  0x2b   :  { %v153_v21 = vmul.f32 0.6931472, %v1977_v18 }
  0x2d   :  { %v161_v22 = vmul.f32 %v160_v19, %v153_v21 }
  0x2f   :  { %v162_v24 = vmul.f32 16.0, %v161_v22 }
  0x31   :  { %vm1957_vm5 = vcmp.lt.s32.totalorder %v162_v24, 0  ;;  %v1958_v26 = vceil.f32 %v162_v24  ;;  %v1959_v27 = vfloor.f32 %v162_v24 }
  0x33   :  { %v1960_v29 = vsel %vm1957_vm5, %v1958_v26, %v1959_v27 }
  0x34   :  { %v1961_v30 = vcvt.f32.s32 %v1960_v29 }
  0x36   :  { %v164_v33 = vadd.s32 16, %v1961_v30 }
  0x38   :  { %vm165_vm7 = vcmp.lt.s32.totalorder %v164_v33, 31 }
  0x39   :  { %v166_v35 = vsel %vm165_vm7, %v164_v33, 31 }
  0x3a   :  { %v2128_v39 = vsel %vm140_vm6, %v139_v3, %v166_v35 }
  0x3b   :  { %v2131_v40 = vperm.slane %v2128_v39, 0  ;;  %v2136_v42 = vperm.slane %v2128_v39, 1  ;;  %v2236_v14 = vperm.slane %v2128_v39, 2  ;;  %v2266_v24 = vperm.slane %v2128_v39, 3 }
  0x3d   :  { %vm205_vm8 = vcmp.eq.s32.totalorder %v2120_v36, %v2131_v40  ;;  %vm197_vm9 = vcmp.eq.s32.totalorder %v2123_v37, %v2131_v40  ;;  %vm189_vm10 = vcmp.eq.s32.totalorder %v2126_v38, %v2131_v40  ;;  %vm181_vm11 = vcmp.eq.s32.totalorder %v2114_v32, %v2131_v40 }
  0x3e   :  { %1861 = vmatpush.msk.msra.mxu0 %vm205_vm8, %v2075_v43  ;;  %v1853_v45 = vsel %vm205_vm8, 1.0, %v2076_v44  ;;  %1865 = vmatpush.msk.msra.mxu3 %vm205_vm8, %v2075_v43  ;;  %v1845_v46 = vsel %vm197_vm9, 1.0, %v2076_v44  ;;  %v1837_v47 = vsel %vm189_vm10, 1.0, %v2076_v44  ;;  %v1829_v48 = vsel %vm181_vm11, 1.0, %v2076_v44 }
  0x3f   :  { %v324_v49 = vsub.f32 %v1853_v45, %v1853_v45  ;;  %v330_v50 = vsub.f32 %v1845_v46, %v1845_v46  ;;  %v336_v51 = vsub.f32 %v1837_v47, %v1837_v47  ;;  %v342_v52 = vsub.f32 %v1829_v48, %v1829_v48 }
  0x40   :  { %1862 = vmatpush.msk.msra.mxu0 %vm197_vm9, %v2075_v43  ;;  %1866 = vmatpush.msk.msra.mxu3 %vm197_vm9, %v2075_v43  ;;  %vm206_vm12 = vcmp.eq.s32.totalorder %v2120_v36, %v2136_v42  ;;  %vm198_vm13 = vcmp.eq.s32.totalorder %v2123_v37, %v2136_v42  ;;  %vm190_vm14 = vcmp.eq.s32.totalorder %v2126_v38, %v2136_v42 }
  0x41   :  { %366 = vmatpush.msra.mxu2 %v324_v49  ;;  %v325_v54 = vand.u32 4294901760, %v324_v49  ;;  %v331_v55 = vand.u32 4294901760, %v330_v50  ;;  %v337_v56 = vand.u32 4294901760, %v336_v51  ;;  %v1854_v57 = vsel %vm206_vm12, 1.0, %v2076_v44 }
  0x42   :  { %1863 = vmatpush.msk.msra.mxu0 %vm189_vm10, %v2075_v43  ;;  %1867 = vmatpush.msk.msra.mxu3 %vm189_vm10, %v2075_v43  ;;  %v2198_v58 = vsub.f32 %v1854_v57, %v1854_v57  ;;  %v343_v59 = vand.u32 4294901760, %v342_v52  ;;  %v1846_v60 = vsel %vm198_vm13, 1.0, %v2076_v44  ;;  %v1838_v61 = vsel %vm190_vm14, 1.0, %v2076_v44 }
  0x43   :  { %369 = vmatpush.msra.mxu2 %v330_v50  ;;  %v326_v62 = vsub.f32 %v324_v49, %v325_v54  ;;  %v332_v63 = vsub.f32 %v330_v50, %v331_v55  ;;  %v338_v0 = vsub.f32 %v336_v51, %v337_v56  ;;  %v2208_v1 = vsub.f32 %v1846_v60, %v1846_v60 }
  0x44   :  { %1864 = vmatpush.msk.msra.mxu0 %vm181_vm11, %v2075_v43  ;;  %1868 = vmatpush.msk.msra.mxu3 %vm181_vm11, %v2075_v43  ;;  %v510_v2 = vand.u32 4294901760, %v2198_v58  ;;  %v2219_v3 = vsub.f32 %v1838_v61, %v1838_v61  ;;  %vm182_vm15 = vcmp.eq.s32.totalorder %v2114_v32, %v2136_v42  ;;  %v344_v6 = vsub.f32 %v342_v52, %v343_v59 }
  0x45   :  { %v327_v4 = vand.u32 4294901760, %v326_v62  ;;  %372 = vmatpush.msra.mxu2 %v336_v51  ;;  %v333_v5 = vand.u32 4294901760, %v332_v63  ;;  %307 = vmatmul.f32.vlgmr.msra.gmra.mxu0 %v2178_v53  ;;  %v516_v7 = vand.u32 4294901760, %v2208_v1  ;;  %v1830_v10 = vsel %vm182_vm15, 1.0, %v2076_v44 }
  0x46   :  { %405 = vmatmul.f32.vlgmr.msra.gmra.mxu3 %v2117_v34  ;;  %424 = vmatpush.msrb.mxu0 %v325_v54  ;;  %v511_v8 = vsub.f32 %v2198_v58, %v510_v2  ;;  %v522_v9 = vand.u32 4294901760, %v2219_v3  ;;  %v339_v11 = vand.u32 4294901760, %v338_v0  ;;  %v2233_v13 = vsub.f32 %v1830_v10, %v1830_v10 }
  0x47   :  { %328 = vmatpush.msra.mxu1 %v327_v4  ;;  %375 = vmatpush.msra.mxu2 %v342_v52  ;;  %v517_v12 = vsub.f32 %v2208_v1, %v516_v7  ;;  %v345_v17 = vand.u32 4294901760, %v344_v6  ;;  %vm207_vm0 = vcmp.eq.s32.totalorder %v2120_v36, %v2236_v14  ;;  %vm199_vm1 = vcmp.eq.s32.totalorder %v2123_v37, %v2236_v14 }
  0x48   :  { %378 = vmatmul.f32.vlgmr.msra.gmra.mxu2 %v2112_v31  ;;  %v512_v15 = vand.u32 4294901760, %v511_v8  ;;  %428 = vmatpush.msrb.mxu0 %v331_v55  ;;  %v523_v16 = vsub.f32 %v2219_v3, %v522_v9  ;;  %v528_v19 = vand.u32 4294901760, %v2233_v13  ;;  %v1855_v23 = vsel %vm207_vm0, 1.0, %v2076_v44 }
  0x49   :  { %334 = vmatpush.msra.mxu1 %v333_v5  ;;  %1873 = vmatpush.msk.msrb.mxu2 %vm206_vm12, %v2075_v43  ;;  %v518_v18 = vand.u32 4294901760, %v517_v12  ;;  %vm191_vm2 = vcmp.eq.s32.totalorder %v2126_v38, %v2236_v14  ;;  %v1847_v26 = vsel %vm199_vm1, 1.0, %v2076_v44  ;;  %v2288_v27 = vsub.f32 %v1855_v23, %v1855_v23 }
  0x4a   :  { %513 = vmatpush.msrb.mxu3 %v512_v15  ;;  %432 = vmatpush.msrb.mxu0 %v337_v56  ;;  %v524_v20 = vand.u32 4294901760, %v523_v16  ;;  %v529_v21 = vsub.f32 %v2233_v13, %v528_v19  ;;  %v1839_v28 = vsel %vm191_vm2, 1.0, %v2076_v44  ;;  %vm183_vm3 = vcmp.eq.s32.totalorder %v2114_v32, %v2236_v14 }
  0x4b   :  { %340 = vmatpush.msra.mxu1 %v339_v11  ;;  %1874 = vmatpush.msk.msrb.mxu2 %vm198_vm13, %v2075_v43  ;;  %vm208_vm4 = vcmp.eq.s32.totalorder %v2120_v36, %v2266_v24  ;;  %v2304_v29 = vsub.f32 %v1847_v26, %v1847_v26  ;;  %vm200_vm5 = vcmp.eq.s32.totalorder %v2123_v37, %v2266_v24  ;;  %v695_v30 = vand.u32 4294901760, %v2288_v27 }
  0x4c   :  { %519 = vmatpush.msrb.mxu3 %v518_v18  ;;  %436 = vmatpush.msrb.mxu0 %v343_v59  ;;  %v530_v22 = vand.u32 4294901760, %v529_v21  ;;  %v2318_v33 = vsub.f32 %v1839_v28, %v1839_v28  ;;  %v1831_v35 = vsel %vm183_vm3, 1.0, %v2076_v44  ;;  %v1856_v41 = vsel %vm208_vm4, 1.0, %v2076_v44 }
  0x4d   :  { %346 = vmatpush.msra.mxu1 %v345_v17  ;;  %1875 = vmatpush.msk.msrb.mxu2 %vm190_vm14, %v2075_v43  ;;  %vm192_vm6 = vcmp.eq.s32.totalorder %v2126_v38, %v2266_v24  ;;  %v701_v40 = vand.u32 4294901760, %v2304_v29  ;;  %v1848_v45 = vsel %vm200_vm5, 1.0, %v2076_v44  ;;  %v2351_v46 = vsub.f32 %v1831_v35, %v1831_v35 }
  0x4e   :  { %348 = vmatmul.f32.vlgmr.msra.gmra.mxu1 %v2109_v25  ;;  %525 = vmatpush.msrb.mxu3 %v524_v20  ;;  %v2353_v47 = vsub.f32 %v1856_v41, %v1856_v41  ;;  %vm184_vm7 = vcmp.eq.s32.totalorder %v2114_v32, %v2266_v24  ;;  %v696_v48 = vsub.f32 %v2288_v27, %v695_v30  ;;  %v707_v49 = vand.u32 4294901760, %v2318_v33 }
  0x4f   :  { %1869 = vmatpush.msk.msrb.mxu1 %vm205_vm8, %v2075_v43  ;;  %1876 = vmatpush.msk.msrb.mxu2 %vm182_vm15, %v2075_v43  ;;  %v1840_v50 = vsel %vm192_vm6, 1.0, %v2076_v44  ;;  %v2374_v51 = vsub.f32 %v1848_v45, %v1848_v45  ;;  %v702_v52 = vsub.f32 %v2304_v29, %v701_v40  ;;  %v1832_v54 = vsel %vm184_vm7, 1.0, %v2076_v44 }
  0x50   :  { %531 = vmatpush.msrb.mxu3 %v530_v22  ;;  %438 = vmatmul.f32.vlgmr.msrb.gmra.mxu0 %v2109_v25  ;;  %v880_v55 = vand.u32 4294901760, %v2353_v47  ;;  %v713_v56 = vand.u32 4294901760, %v2351_v46  ;;  %v2392_v57 = vsub.f32 %v1840_v50, %v1840_v50  ;;  %v708_v59 = vsub.f32 %v2318_v33, %v707_v49 }
  0x51   :  { %1870 = vmatpush.msk.msrb.mxu1 %vm197_vm9, %v2075_v43  ;;  %492 = vmatmul.f32.vlgmr.msrb.gmra.mxu2 %v2178_v53  ;;  %v886_v60 = vand.u32 4294901760, %v2374_v51  ;;  %v2411_v61 = vsub.f32 %v1832_v54, %v1832_v54  ;;  %v703_v62 = vand.u32 4294901760, %v702_v52  ;;  %v2607_v35 = vperm.slane %v2128_v39, 7 }
  0x52   :  { %533 = vmatmul.f32.vlgmr.msrb.gmra.mxu3 %v2109_v25  ;;  %609 = vmatpush.msra.mxu2 %v510_v2  ;;  %v881_v42 = vsub.f32 %v2353_v47, %v880_v55  ;;  %v714_v63 = vsub.f32 %v2351_v46, %v713_v56  ;;  %v892_v0 = vand.u32 4294901760, %v2392_v57 }
  0x53   :  { %1871 = vmatpush.msk.msrb.mxu1 %vm189_vm10, %v2075_v43  ;;  %551 = vmatpush.msra.mxu0 %v2198_v58  ;;  %v697_v58 = vand.u32 4294901760, %v696_v48  ;;  %v887_v2 = vsub.f32 %v2374_v51, %v886_v60 }
  0x54   :  { %1881 = vmatpush.msk.msra.mxu3 %vm206_vm12, %v2075_v43  ;;  %613 = vmatpush.msra.mxu2 %v516_v7  ;;  %v882_v4 = vand.u32 4294901760, %v881_v42  ;;  %v715_v5 = vand.u32 4294901760, %v714_v63  ;;  %v893_v6 = vsub.f32 %v2392_v57, %v892_v0  ;;  %v2455_v7 = vperm.slane %v2128_v39, 4 }
  0x55   :  { %1872 = vmatpush.msk.msrb.mxu1 %vm181_vm11, %v2075_v43  ;;  %554 = vmatpush.msra.mxu0 %v2208_v1  ;;  %v709_v1 = vand.u32 4294901760, %v708_v59  ;;  %v888_v8 = vand.u32 4294901760, %v887_v2 }
  0x56   :  { %1882 = vmatpush.msk.msra.mxu3 %vm198_vm13, %v2075_v43  ;;  %463 = vmatmul.f32.vlgmr.msrb.gmra.mxu1 %v2109_v25  ;;  %v894_v10 = vand.u32 4294901760, %v893_v6  ;;  %vm209_vm8 = vcmp.eq.s32.totalorder %v2120_v36, %v2455_v7  ;;  %vm201_vm9 = vcmp.eq.s32.totalorder %v2123_v37, %v2455_v7  ;;  %vm193_vm10 = vcmp.eq.s32.totalorder %v2126_v38, %v2455_v7 }
  0x57   :  { %1877 = vmatpush.msk.msra.mxu1 %vm206_vm12, %v2075_v43  ;;  %617 = vmatpush.msra.mxu2 %v522_v9  ;;  %v1857_v12 = vsel %vm209_vm8, 1.0, %v2076_v44  ;;  %v1849_v15 = vsel %vm201_vm9, 1.0, %v2076_v44  ;;  %vm185_vm11 = vcmp.eq.s32.totalorder %v2114_v32, %v2455_v7  ;;  %v1841_v17 = vsel %vm193_vm10, 1.0, %v2076_v44 }
  0x58   :  { %557 = vmatpush.msra.mxu0 %v2219_v3  ;;  %1883 = vmatpush.msk.msra.mxu3 %vm190_vm14, %v2075_v43  ;;  %v898_v3 = vand.u32 4294901760, %v2411_v61  ;;  %v2515_v16 = vsub.f32 %v1857_v12, %v1857_v12  ;;  %v2530_v18 = vsub.f32 %v1849_v15, %v1849_v15  ;;  %v1833_v20 = vsel %vm185_vm11, 1.0, %v2076_v44 }
  0x59   :  { %1878 = vmatpush.msk.msra.mxu1 %vm198_vm13, %v2075_v43  ;;  %621 = vmatpush.msra.mxu2 %v528_v19  ;;  %v2533_v19 = vperm.slane %v2128_v39, 6  ;;  %v2553_v22 = vsub.f32 %v1841_v17, %v1841_v17  ;;  %v2575_v26 = vsub.f32 %v1833_v20, %v1833_v20 }
  0x5a   :  { %560 = vmatpush.msra.mxu0 %v2233_v13  ;;  %1884 = vmatpush.msk.msra.mxu3 %vm182_vm15, %v2075_v43  ;;  %v899_v9 = vsub.f32 %v2411_v61, %v898_v3  ;;  %v2494_v13 = vperm.slane %v2128_v39, 5  ;;  %v1065_v21 = vand.u32 4294901760, %v2515_v16  ;;  %v1071_v23 = vand.u32 4294901760, %v2530_v18 }
  0x5b   :  { %563 = vmatmul.f32.vlgmr.msra.gmra.mxu0 %v2112_v31  ;;  %1879 = vmatpush.msk.msra.mxu1 %vm190_vm14, %v2075_v43  ;;  %vm211_vm14 = vcmp.eq.s32.totalorder %v2120_v36, %v2533_v19 }
  0x5c   :  { %623 = vmatmul.f32.vlgmr.msra.gmra.mxu2 %v2109_v25  ;;  %648 = vmatmul.f32.vlgmr.msra.gmra.mxu3 %v2109_v25  ;;  %v900_v11 = vand.u32 4294901760, %v899_v9  ;;  %vm210_vm12 = vcmp.eq.s32.totalorder %v2120_v36, %v2494_v13  ;;  %vm202_vm13 = vcmp.eq.s32.totalorder %v2123_v37, %v2494_v13  ;;  %v1072_v39 = vsub.f32 %v2530_v18, %v1071_v23 }
  0x5d   :  { %736 = vmatpush.msrb.mxu2 %v2288_v27  ;;  %1885 = vmatpush.msk.msrb.mxu0 %vm207_vm0, %v2075_v43  ;;  %v1858_v14 = vsel %vm210_vm12, 1.0, %v2076_v44  ;;  %v1850_v27 = vsel %vm202_vm13, 1.0, %v2076_v44 }
  0x5e   :  { %1889 = vmatpush.msk.msrb.mxu3 %vm207_vm0, %v2075_v43  ;;  %1880 = vmatpush.msk.msra.mxu1 %vm182_vm15, %v2075_v43  ;;  %vm194_vm15 = vcmp.eq.s32.totalorder %v2126_v38, %v2494_v13  ;;  %v2586_v28 = vsub.f32 %v1858_v14, %v1858_v14  ;;  %v2614_v41 = vsub.f32 %v1850_v27, %v1850_v27  ;;  %v1073_v52 = vand.u32 4294901760, %v1072_v39 }
  0x5f   :  { %739 = vmatpush.msrb.mxu2 %v2304_v29  ;;  %1886 = vmatpush.msk.msrb.mxu0 %vm199_vm1, %v2075_v43  ;;  %v1066_v29 = vsub.f32 %v2515_v16, %v1065_v21 }
  0x60   :  { %1890 = vmatpush.msk.msrb.mxu3 %vm199_vm1, %v2075_v43  ;;  %590 = vmatmul.f32.vlgmr.msra.gmra.mxu1 %v2117_v34  ;;  %v1250_v45 = vand.u32 4294901760, %v2586_v28  ;;  %v1256_v50 = vand.u32 4294901760, %v2614_v41 }
  0x61   :  { %698 = vmatpush.msrb.mxu1 %v697_v58  ;;  %742 = vmatpush.msrb.mxu2 %v2318_v33  ;;  %v1842_v33 = vsel %vm194_vm15, 1.0, %v2076_v44  ;;  %v1067_v48 = vand.u32 4294901760, %v1066_v29 }
  0x62   :  { %1887 = vmatpush.msk.msrb.mxu0 %vm191_vm2, %v2075_v43  ;;  %1891 = vmatpush.msk.msrb.mxu3 %vm191_vm2, %v2075_v43  ;;  %v1251_v24 = vsub.f32 %v2586_v28, %v1250_v45 }
  0x63   :  { %704 = vmatpush.msrb.mxu1 %v703_v62  ;;  %745 = vmatpush.msrb.mxu2 %v2351_v46  ;;  %v1083_v46 = vand.u32 4294901760, %v2575_v26 }
  0x64   :  { %1888 = vmatpush.msk.msrb.mxu0 %vm183_vm3, %v2075_v43  ;;  %1892 = vmatpush.msk.msrb.mxu3 %vm183_vm3, %v2075_v43  ;;  %v1252_v59 = vand.u32 4294901760, %v1251_v24 }
  0x65   :  { %677 = vmatmul.f32.vlgmr.msrb.gmra.mxu0 %v2178_v53  ;;  %710 = vmatpush.msrb.mxu1 %v709_v1  ;;  %v1084_v54 = vsub.f32 %v2575_v26, %v1083_v46  ;;  %v1859_v1 = vsel %vm211_vm14, 1.0, %v2076_v44 }
  0x66   :  { %748 = vmatmul.f32.vlgmr.msrb.gmra.mxu2 %v2112_v31  ;;  %775 = vmatmul.f32.vlgmr.msrb.gmra.mxu3 %v2117_v34 }
  0x67   :  { %1897 = vmatpush.msk.msra.mxu2 %vm208_vm4, %v2075_v43  ;;  %794 = vmatpush.msra.mxu0 %v695_v30  ;;  %v1077_v30 = vand.u32 4294901760, %v2553_v22 }
  0x68   :  { %883 = vmatpush.msra.mxu3 %v882_v4  ;;  %716 = vmatpush.msrb.mxu1 %v715_v5 }
  0x69   :  { %1898 = vmatpush.msk.msra.mxu2 %vm200_vm5, %v2075_v43  ;;  %798 = vmatpush.msra.mxu0 %v701_v40 }
  0x6a   :  { %889 = vmatpush.msra.mxu3 %v888_v8  ;;  %718 = vmatmul.f32.vlgmr.msrb.gmra.mxu1 %v2109_v25 }
  0x6b   :  { %1893 = vmatpush.msk.msra.mxu1 %vm207_vm0, %v2075_v43  ;;  %1899 = vmatpush.msk.msra.mxu2 %vm192_vm6, %v2075_v43  ;;  %vm186_vm0 = vcmp.eq.s32.totalorder %v2114_v32, %v2494_v13 }
  0x6c   :  { %802 = vmatpush.msra.mxu0 %v707_v49  ;;  %895 = vmatpush.msra.mxu3 %v894_v10  ;;  %v1834_v40 = vsel %vm186_vm0, 1.0, %v2076_v44  ;;  %v1078_v49 = vsub.f32 %v2553_v22, %v1077_v30 }
  0x6d   :  { %1894 = vmatpush.msk.msra.mxu1 %vm199_vm1, %v2075_v43  ;;  %1900 = vmatpush.msk.msra.mxu2 %vm184_vm7, %v2075_v43  ;;  %vm203_vm1 = vcmp.eq.s32.totalorder %v2123_v37, %v2533_v19 }
  0x6e   :  { %806 = vmatpush.msra.mxu0 %v713_v56  ;;  %901 = vmatpush.msra.mxu3 %v900_v11  ;;  %v1079_v56 = vand.u32 4294901760, %v1078_v49  ;;  %v1851_v2 = vsel %vm203_vm1, 1.0, %v2076_v44 }
  0x6f   :  { %808 = vmatmul.f32.vlgmr.msra.gmra.mxu0 %v2109_v25  ;;  %1895 = vmatpush.msk.msra.mxu1 %vm191_vm2, %v2075_v43  ;;  %vm212_vm2 = vcmp.eq.s32.totalorder %v2120_v36, %v2607_v35  ;;  %v2762_v5 = vsub.f32 %v1851_v2, %v1851_v2 }
  0x70   :  { %862 = vmatmul.f32.vlgmr.msra.gmra.mxu2 %v2178_v53  ;;  %903 = vmatmul.f32.vlgmr.msra.gmra.mxu3 %v2109_v25  ;;  %v1860_v7 = vsel %vm212_vm2, 1.0, %v2076_v44 }
  0x71   :  { %979 = vmatpush.msrb.mxu2 %v880_v55  ;;  %921 = vmatpush.msrb.mxu0 %v2353_v47  ;;  %v2634_v47 = vsub.f32 %v1842_v33, %v1842_v33  ;;  %v1441_v10 = vand.u32 4294901760, %v2762_v5  ;;  %v2811_v15 = vsub.f32 %v1860_v7, %v1860_v7 }
  0x72   :  { %1905 = vmatpush.msk.msrb.mxu3 %vm208_vm4, %v2075_v43  ;;  %1896 = vmatpush.msk.msra.mxu1 %vm183_vm3, %v2075_v43  ;;  %vm204_vm3 = vcmp.eq.s32.totalorder %v2123_v37, %v2607_v35 }
  0x73   :  { %983 = vmatpush.msrb.mxu2 %v886_v60  ;;  %924 = vmatpush.msrb.mxu0 %v2374_v51  ;;  %v2653_v51 = vsub.f32 %v1834_v40, %v1834_v40  ;;  %v1262_v55 = vand.u32 4294901760, %v2634_v47  ;;  %v1085_v60 = vand.u32 4294901760, %v1084_v54  ;;  %v1852_v11 = vsel %vm204_vm3, 1.0, %v2076_v44 }
  0x74   :  { %1906 = vmatpush.msk.msrb.mxu3 %vm200_vm5, %v2075_v43  ;;  %833 = vmatmul.f32.vlgmr.msra.gmra.mxu1 %v2109_v25  ;;  %v2834_v20 = vsub.f32 %v1852_v11, %v1852_v11  ;;  %v1620_v14 = vand.u32 4294901760, %v2811_v15 }
  0x75   :  { %1901 = vmatpush.msk.msrb.mxu1 %vm208_vm4, %v2075_v43  ;;  %987 = vmatpush.msrb.mxu2 %v892_v0  ;;  %v1268_v58 = vand.u32 4294901760, %v2653_v51  ;;  %vm195_vm4 = vcmp.eq.s32.totalorder %v2126_v38, %v2533_v19 }
  0x76   :  { %927 = vmatpush.msrb.mxu0 %v2392_v57  ;;  %1907 = vmatpush.msk.msrb.mxu3 %vm192_vm6, %v2075_v43  ;;  %v1257_v57 = vsub.f32 %v2614_v41, %v1256_v50  ;;  %v1843_v4 = vsel %vm195_vm4, 1.0, %v2076_v44  ;;  %v1621_v13 = vsub.f32 %v2811_v15, %v1620_v14 }
  0x77   :  { %1902 = vmatpush.msk.msrb.mxu1 %vm200_vm5, %v2075_v43  ;;  %991 = vmatpush.msrb.mxu2 %v898_v3  ;;  %v1269_v42 = vsub.f32 %v2653_v51, %v1268_v58  ;;  %v2749_v3 = vsub.f32 %v1859_v1, %v1859_v1  ;;  %vm187_vm5 = vcmp.eq.s32.totalorder %v2114_v32, %v2533_v19 }
  0x78   :  { %930 = vmatpush.msrb.mxu0 %v2411_v61  ;;  %1908 = vmatpush.msk.msrb.mxu3 %vm184_vm7, %v2075_v43  ;;  %v1263_v61 = vsub.f32 %v2634_v47, %v1262_v55  ;;  %v1258_v62 = vand.u32 4294901760, %v1257_v57  ;;  %v2776_v8 = vsub.f32 %v1843_v4, %v1843_v4  ;;  %v1835_v9 = vsel %vm187_vm5, 1.0, %v2076_v44 }
  0x79   :  { %933 = vmatmul.f32.vlgmr.msrb.gmra.mxu0 %v2112_v31  ;;  %1903 = vmatpush.msk.msrb.mxu1 %vm192_vm6, %v2075_v43  ;;  %v1270_v0 = vand.u32 4294901760, %v1269_v42  ;;  %v1435_v6 = vand.u32 4294901760, %v2749_v3  ;;  %vm196_vm6 = vcmp.eq.s32.totalorder %v2126_v38, %v2607_v35  ;;  %v2809_v12 = vsub.f32 %v1835_v9, %v1835_v9 }
  0x7a   :  { %993 = vmatmul.f32.vlgmr.msrb.gmra.mxu2 %v2109_v25  ;;  %1018 = vmatmul.f32.vlgmr.msrb.gmra.mxu3 %v2109_v25  ;;  %v1264_v63 = vand.u32 4294901760, %v1263_v61  ;;  %v1447_v17 = vand.u32 4294901760, %v2776_v8 }
  0x7b   :  { %1106 = vmatpush.msra.mxu2 %v2515_v16  ;;  %1909 = vmatpush.msk.msra.mxu0 %vm209_vm8, %v2075_v43  ;;  %v1436_v16 = vsub.f32 %v2749_v3, %v1435_v6 }
  0x7c   :  { %1913 = vmatpush.msk.msra.mxu3 %vm209_vm8, %v2075_v43  ;;  %1904 = vmatpush.msk.msrb.mxu1 %vm184_vm7, %v2075_v43  ;;  %vm188_vm7 = vcmp.eq.s32.totalorder %v2114_v32, %v2607_v35 }
  0x7d   :  { %1109 = vmatpush.msra.mxu2 %v2530_v18  ;;  %1910 = vmatpush.msk.msra.mxu0 %vm201_vm9, %v2075_v43  ;;  %v1844_v18 = vsel %vm196_vm6, 1.0, %v2076_v44  ;;  %v1437_v27 = vand.u32 4294901760, %v1436_v16 }
  0x7e   :  { %1914 = vmatpush.msk.msra.mxu3 %vm201_vm9, %v2075_v43  ;;  %960 = vmatmul.f32.vlgmr.msrb.gmra.mxu1 %v2117_v34 }
  0x7f   :  { %1068 = vmatpush.msra.mxu1 %v1067_v48  ;;  %1112 = vmatpush.msra.mxu2 %v2553_v22  ;;  %v1836_v22 = vsel %vm188_vm7, 1.0, %v2076_v44  ;;  %v1448_v44 = vsub.f32 %v2776_v8, %v1447_v17 }
  0x80   :  { %1911 = vmatpush.msk.msra.mxu0 %vm193_vm10, %v2075_v43  ;;  %1915 = vmatpush.msk.msra.mxu3 %vm193_vm10, %v2075_v43  ;;  %v2869_v29 = vsub.f32 %v1836_v22, %v1836_v22 }
  0x81   :  { %1074 = vmatpush.msra.mxu1 %v1073_v52  ;;  %1115 = vmatpush.msra.mxu2 %v2575_v26  ;;  %v2852_v26 = vsub.f32 %v1844_v18, %v1844_v18  ;;  %v1449_v39 = vand.u32 4294901760, %v1448_v44 }
  0x82   :  { %1912 = vmatpush.msk.msra.mxu0 %vm185_vm11, %v2075_v43  ;;  %1916 = vmatpush.msk.msra.mxu3 %vm185_vm11, %v2075_v43 }
  0x83   :  { %1047 = vmatmul.f32.vlgmr.msra.gmra.mxu0 %v2178_v53  ;;  %1080 = vmatpush.msra.mxu1 %v1079_v56 }
  0x84   :  { %1118 = vmatmul.f32.vlgmr.msra.gmra.mxu2 %v2112_v31  ;;  %1145 = vmatmul.f32.vlgmr.msra.gmra.mxu3 %v2117_v34 }
  0x85   :  { %1921 = vmatpush.msk.msrb.mxu2 %vm210_vm12, %v2075_v43  ;;  %1164 = vmatpush.msrb.mxu0 %v1065_v21  ;;  %v1442_v21 = vsub.f32 %v2762_v5, %v1441_v10 }
  0x86   :  { %1253 = vmatpush.msrb.mxu3 %v1252_v59  ;;  %1086 = vmatpush.msra.mxu1 %v1085_v60 }
  0x87   :  { %1922 = vmatpush.msk.msrb.mxu2 %vm202_vm13, %v2075_v43  ;;  %1168 = vmatpush.msrb.mxu0 %v1071_v23  ;;  %v1453_v23 = vand.u32 4294901760, %v2809_v12 }
  0x88   :  { %1259 = vmatpush.msrb.mxu3 %v1258_v62  ;;  %1088 = vmatmul.f32.vlgmr.msra.gmra.mxu1 %v2109_v25 }
  0x89   :  { %1917 = vmatpush.msk.msrb.mxu1 %vm209_vm8, %v2075_v43  ;;  %1923 = vmatpush.msk.msrb.mxu2 %vm194_vm15, %v2075_v43  ;;  %v1454_v33 = vsub.f32 %v2809_v12, %v1453_v23 }
  0x8a   :  { %1172 = vmatpush.msrb.mxu0 %v1077_v30  ;;  %1265 = vmatpush.msrb.mxu3 %v1264_v63  ;;  %v1443_v30 = vand.u32 4294901760, %v1442_v21 }
  0x8b   :  { %1918 = vmatpush.msk.msrb.mxu1 %vm201_vm9, %v2075_v43  ;;  %1924 = vmatpush.msk.msrb.mxu2 %vm186_vm0, %v2075_v43 }
  0x8c   :  { %1176 = vmatpush.msrb.mxu0 %v1083_v46  ;;  %1271 = vmatpush.msrb.mxu3 %v1270_v0  ;;  %v1622_v46 = vand.u32 4294901760, %v1621_v13 }
  0x8d   :  { %1178 = vmatmul.f32.vlgmr.msrb.gmra.mxu0 %v2109_v25  ;;  %1919 = vmatpush.msk.msrb.mxu1 %vm193_vm10, %v2075_v43 }
  0x8e   :  { %1232 = vmatmul.f32.vlgmr.msrb.gmra.mxu2 %v2178_v53  ;;  %1273 = vmatmul.f32.vlgmr.msrb.gmra.mxu3 %v2109_v25 }
  0x8f   :  { %1349 = vmatpush.msra.mxu2 %v1250_v45  ;;  %1291 = vmatpush.msra.mxu0 %v2586_v28  ;;  %v1626_v28 = vand.u32 4294901760, %v2834_v20  ;;  %v1638_v45 = vand.u32 4294901760, %v2869_v29 }
  0x90   :  { %1929 = vmatpush.msk.msra.mxu3 %vm210_vm12, %v2075_v43  ;;  %1920 = vmatpush.msk.msrb.mxu1 %vm185_vm11, %v2075_v43 }
  0x91   :  { %1353 = vmatpush.msra.mxu2 %v1256_v50  ;;  %1294 = vmatpush.msra.mxu0 %v2614_v41  ;;  %v1632_v41 = vand.u32 4294901760, %v2852_v26  ;;  %v1627_v40 = vsub.f32 %v2834_v20, %v1626_v28  ;;  %v1639_v50 = vsub.f32 %v2869_v29, %v1638_v45 }
  0x92   :  { %1930 = vmatpush.msk.msra.mxu3 %vm202_vm13, %v2075_v43  ;;  %1203 = vmatmul.f32.vlgmr.msrb.gmra.mxu1 %v2109_v25 }
  0x93   :  { %1925 = vmatpush.msk.msra.mxu1 %vm210_vm12, %v2075_v43  ;;  %1357 = vmatpush.msra.mxu2 %v1262_v55  ;;  %v1633_v48 = vsub.f32 %v2852_v26, %v1632_v41  ;;  %v1628_v49 = vand.u32 4294901760, %v1627_v40  ;;  %v1640_v52 = vand.u32 4294901760, %v1639_v50 }
  0x94   :  { %1297 = vmatpush.msra.mxu0 %v2634_v47  ;;  %1931 = vmatpush.msk.msra.mxu3 %vm194_vm15, %v2075_v43  ;;  %v1455_v47 = vand.u32 4294901760, %v1454_v33 }
  0x95   :  { %1926 = vmatpush.msk.msra.mxu1 %vm202_vm13, %v2075_v43  ;;  %1361 = vmatpush.msra.mxu2 %v1268_v58 }
  0x96   :  { %1300 = vmatpush.msra.mxu0 %v2653_v51  ;;  %1932 = vmatpush.msk.msra.mxu3 %vm186_vm0, %v2075_v43  ;;  %v1634_v51 = vand.u32 4294901760, %v1633_v48 }
  0x97   :  { %1303 = vmatmul.f32.vlgmr.msra.gmra.mxu0 %v2112_v31  ;;  %1927 = vmatpush.msk.msra.mxu1 %vm194_vm15, %v2075_v43 }
  0x98   :  { %1363 = vmatmul.f32.vlgmr.msra.gmra.mxu2 %v2109_v25  ;;  %1388 = vmatmul.f32.vlgmr.msra.gmra.mxu3 %v2109_v25 }
  0x99   :  { %1476 = vmatpush.msrb.mxu2 %v2749_v3  ;;  %1933 = vmatpush.msk.msrb.mxu0 %vm211_vm14, %v2075_v43 }
  0x9a   :  { %1937 = vmatpush.msk.msrb.mxu3 %vm211_vm14, %v2075_v43  ;;  %1928 = vmatpush.msk.msra.mxu1 %vm186_vm0, %v2075_v43 }
  0x9b   :  { %1479 = vmatpush.msrb.mxu2 %v2762_v5  ;;  %1934 = vmatpush.msk.msrb.mxu0 %vm203_vm1, %v2075_v43 }
  0x9c   :  { %1938 = vmatpush.msk.msrb.mxu3 %vm203_vm1, %v2075_v43  ;;  %1330 = vmatmul.f32.vlgmr.msra.gmra.mxu1 %v2117_v34 }
  0x9d   :  { %1438 = vmatpush.msrb.mxu1 %v1437_v27  ;;  %1482 = vmatpush.msrb.mxu2 %v2776_v8 }
  0x9e   :  { %1935 = vmatpush.msk.msrb.mxu0 %vm195_vm4, %v2075_v43  ;;  %1939 = vmatpush.msk.msrb.mxu3 %vm195_vm4, %v2075_v43 }
  0x9f   :  { %1444 = vmatpush.msrb.mxu1 %v1443_v30  ;;  %1485 = vmatpush.msrb.mxu2 %v2809_v12 }
  0xa0   :  { %1936 = vmatpush.msk.msrb.mxu0 %vm187_vm5, %v2075_v43  ;;  %1940 = vmatpush.msk.msrb.mxu3 %vm187_vm5, %v2075_v43 }
  0xa1   :  { %1417 = vmatmul.f32.vlgmr.msrb.gmra.mxu0 %v2178_v53  ;;  %1450 = vmatpush.msrb.mxu1 %v1449_v39 }
  0xa2   :  { %1488 = vmatmul.f32.vlgmr.msrb.gmra.mxu2 %v2112_v31  ;;  %1515 = vmatmul.f32.vlgmr.msrb.gmra.mxu3 %v2117_v34 }
  0xa3   :  { %1945 = vmatpush.msk.msra.mxu2 %vm212_vm2, %v2075_v43  ;;  %1534 = vmatpush.msra.mxu0 %v1435_v6 }
  0xa4   :  { %1623 = vmatpush.msra.mxu3 %v1622_v46  ;;  %1456 = vmatpush.msrb.mxu1 %v1455_v47 }
  0xa5   :  { %1946 = vmatpush.msk.msra.mxu2 %vm204_vm3, %v2075_v43  ;;  %1538 = vmatpush.msra.mxu0 %v1441_v10 }
  0xa6   :  { %1629 = vmatpush.msra.mxu3 %v1628_v49  ;;  %1458 = vmatmul.f32.vlgmr.msrb.gmra.mxu1 %v2109_v25 }
  0xa7   :  { %1941 = vmatpush.msk.msra.mxu1 %vm211_vm14, %v2075_v43  ;;  %1947 = vmatpush.msk.msra.mxu2 %vm196_vm6, %v2075_v43 }
  0xa8   :  { %1542 = vmatpush.msra.mxu0 %v1447_v17  ;;  %1635 = vmatpush.msra.mxu3 %v1634_v51 }
  0xa9   :  { %1942 = vmatpush.msk.msra.mxu1 %vm203_vm1, %v2075_v43  ;;  %1948 = vmatpush.msk.msra.mxu2 %vm188_vm7, %v2075_v43 }
  0xaa   :  { %1546 = vmatpush.msra.mxu0 %v1453_v23  ;;  %1641 = vmatpush.msra.mxu3 %v1640_v52 }
  0xab   :  { %1548 = vmatmul.f32.vlgmr.msra.gmra.mxu0 %v2109_v25  ;;  %1943 = vmatpush.msk.msra.mxu1 %vm195_vm4, %v2075_v43 }
  0xac   :  { %1602 = vmatmul.f32.vlgmr.msra.gmra.mxu2 %v2178_v53  ;;  %1643 = vmatmul.f32.vlgmr.msra.gmra.mxu3 %v2109_v25 }
  0xad   :  { %1719 = vmatpush.msrb.mxu2 %v1620_v14  ;;  %1661 = vmatpush.msrb.mxu0 %v2811_v15 }
  0xae   :  { %1944 = vmatpush.msk.msra.mxu1 %vm187_vm5, %v2075_v43  ;;  %1953 = vmatpush.msk.msrb.mxu3 %vm212_vm2, %v2075_v43 }
  0xaf   :  { %1723 = vmatpush.msrb.mxu2 %v1626_v28  ;;  %1664 = vmatpush.msrb.mxu0 %v2834_v20 }
  0xb0   :  { %1573 = vmatmul.f32.vlgmr.msra.gmra.mxu1 %v2109_v25  ;;  %1954 = vmatpush.msk.msrb.mxu3 %vm204_vm3, %v2075_v43 }
  0xb1   :  { %1949 = vmatpush.msk.msrb.mxu1 %vm212_vm2, %v2075_v43  ;;  %1727 = vmatpush.msrb.mxu2 %v1632_v41 }
  0xb2   :  { %1667 = vmatpush.msrb.mxu0 %v2852_v26  ;;  %1955 = vmatpush.msk.msrb.mxu3 %vm196_vm6, %v2075_v43 }
  0xb3   :  { %1950 = vmatpush.msk.msrb.mxu1 %vm204_vm3, %v2075_v43  ;;  %1731 = vmatpush.msrb.mxu2 %v1638_v45 }
  0xb4   :  { %1670 = vmatpush.msrb.mxu0 %v2869_v29  ;;  %1733 = vmatmul.f32.vlgmr.msrb.gmra.mxu2 %v2109_v25 }
  0xb5   :  { %1673 = vmatmul.f32.vlgmr.msrb.gmra.mxu0 %v2112_v31  ;;  %1951 = vmatpush.msk.msrb.mxu1 %vm196_vm6, %v2075_v43 }
  0xb6   :  { %1956 = vmatpush.msk.msrb.mxu3 %vm188_vm7, %v2075_v43 }
  0xb7   :  { %1952 = vmatpush.msk.msrb.mxu1 %vm188_vm7, %v2075_v43  ;;  %1758 = vmatmul.f32.vlgmr.msrb.gmra.mxu3 %v2109_v25 }
  0xb8   :  { %1700 = vmatmul.f32.vlgmr.msrb.gmra.mxu1 %v2117_v34 }
  0xc2   :  { %v308_v31 = vpop.f32.mrf.mxu0 }
  0xc9   :  { %v406_v36 = vpop.f32.mrf.mxu3 }
  0xcb   :  { %v349_v37 = vpop.f32.mrf.mxu1  ;;  %v379_v53 = vpop.f32.mrf.mxu2 }
  0xcc   :  { %v350_v38 = vadd.f32 %v349_v37, %v308_v31 }
  0xcd   :  { %v439_v24 = vpop.f32.mrf.mxu0 }
  0xce   :  { %v380_v19 = vadd.f32 %v379_v53, %v350_v38 }
  0xd0   :  { %v407_v54 = vadd.f32 %v406_v36, %v380_v19 }
  0xd2   :  { %v440_v55 = vadd.f32 %v439_v24, %v407_v54 }
  0xd3   :  { %v464_v56 = vpop.f32.mrf.mxu1 }
  0xd4   :  { %v465_v57 = vadd.f32 %v464_v56, %v440_v55  ;;  %v493_v58 = vpop.f32.mrf.mxu2 }
  0xd5   :  { %v534_v59 = vpop.f32.mrf.mxu3 }
  0xd6   :  { %1763 = vst [vmem:[#allocation9] ss:$8 sm:$0xf] %v465_v57  ;;  %v535_v32 = vadd.f32 %v534_v59, %v493_v58 }
  0xd7   :  { %1764 = vst [vmem:[#allocation9] ss:$8 sm:$0xf0] %v465_v57 }
  0xd8   :  { %v564_v43 = vpop.f32.mrf.mxu0 }
  0xd9   :  { %v565_v25 = vadd.f32 %v564_v43, %v535_v32 }
  0xdd   :  { %v591_v35 = vpop.f32.mrf.mxu1 }
  0xde   :  { %v592_v34 = vadd.f32 %v591_v35, %v565_v25 }
  0xdf   :  { %v624_v60 = vpop.f32.mrf.mxu2  ;;  %v649_v61 = vpop.f32.mrf.mxu3 }
  0xe0   :  { %v625_v62 = vadd.f32 %v624_v60, %v592_v34 }
  0xe2   :  { %v650_v42 = vadd.f32 %v649_v61, %v625_v62  ;;  %v678_v63 = vpop.f32.mrf.mxu0 }
  0xe4   :  { %1767 = vst [vmem:[#allocation9 + $0x1] ss:$8 sm:$0xf] %v650_v42 }
  0xe5   :  { %1768 = vst [vmem:[#allocation9 + $0x1] ss:$8 sm:$0xf0] %v650_v42 }
  0xe7   :  { %v719_v0 = vpop.f32.mrf.mxu1 }
  0xe8   :  { %v720_v1 = vadd.f32 %v719_v0, %v678_v63 }
  0xe9   :  { %v749_v2 = vpop.f32.mrf.mxu2  ;;  %v776_v3 = vpop.f32.mrf.mxu3 }
  0xea   :  { %v750_v4 = vadd.f32 %v749_v2, %v720_v1 }
  0xec   :  { %v777_v5 = vadd.f32 %v776_v3, %v750_v4  ;;  %v809_v6 = vpop.f32.mrf.mxu0 }
  0xee   :  { %v810_v8 = vadd.f32 %v809_v6, %v777_v5 }
  0xf1   :  { %v834_v9 = vpop.f32.mrf.mxu1 }
  0xf2   :  { %v835_v7 = vadd.f32 %v834_v9, %v810_v8 }
  0xf3   :  { %v863_v10 = vpop.f32.mrf.mxu2  ;;  %v904_v11 = vpop.f32.mrf.mxu3 }
  0xf4   :  { %1771 = vst [vmem:[#allocation9 + $0x2] ss:$8 sm:$0xf] %v835_v7  ;;  %v905_v12 = vadd.f32 %v904_v11, %v863_v10 }
  0xf5   :  { %1772 = vst [vmem:[#allocation9 + $0x2] ss:$8 sm:$0xf0] %v835_v7 }
  0xf6   :  { %v934_v15 = vpop.f32.mrf.mxu0 }
  0xf7   :  { %v935_v16 = vadd.f32 %v934_v15, %v905_v12 }
  0xfb   :  { %v961_v17 = vpop.f32.mrf.mxu1 }
  0xfc   :  { %v962_v18 = vadd.f32 %v961_v17, %v935_v16 }
  0xfd   :  { %v994_v20 = vpop.f32.mrf.mxu2  ;;  %v1019_v21 = vpop.f32.mrf.mxu3 }
  0xfe   :  { %v995_v22 = vadd.f32 %v994_v20, %v962_v18 }
 0x100   :  { %v1020_v14 = vadd.f32 %v1019_v21, %v995_v22  ;;  %v1048_v23 = vpop.f32.mrf.mxu0 }
 0x102   :  { %1775 = vst [vmem:[#allocation9 + $0x3] ss:$8 sm:$0xf] %v1020_v14 }
 0x103   :  { %1776 = vst [vmem:[#allocation9 + $0x3] ss:$8 sm:$0xf0] %v1020_v14 }
 0x105   :  { %v1089_v26 = vpop.f32.mrf.mxu1 }
 0x106   :  { %v1090_v27 = vadd.f32 %v1089_v26, %v1048_v23 }
 0x107   :  { %v1119_v44 = vpop.f32.mrf.mxu2  ;;  %v1146_v28 = vpop.f32.mrf.mxu3 }
 0x108   :  { %v1120_v29 = vadd.f32 %v1119_v44, %v1090_v27 }
 0x10a   :  { %v1147_v30 = vadd.f32 %v1146_v28, %v1120_v29  ;;  %v1179_v13 = vpop.f32.mrf.mxu0 }
 0x10c   :  { %v1180_v33 = vadd.f32 %v1179_v13, %v1147_v30 }
 0x10f   :  { %v1204_v41 = vpop.f32.mrf.mxu1 }
 0x110   :  { %v1205_v39 = vadd.f32 %v1204_v41, %v1180_v33 }
 0x111   :  { %v1233_v40 = vpop.f32.mrf.mxu2  ;;  %v1274_v45 = vpop.f32.mrf.mxu3 }
 0x112   :  { %1779 = vst [vmem:[#allocation9 + $0x4] ss:$8 sm:$0xf] %v1205_v39  ;;  %v1275_v46 = vadd.f32 %v1274_v45, %v1233_v40 }
 0x113   :  { %1780 = vst [vmem:[#allocation9 + $0x4] ss:$8 sm:$0xf0] %v1205_v39 }
 0x114   :  { %v1304_v47 = vpop.f32.mrf.mxu0 }
 0x115   :  { %v1305_v48 = vadd.f32 %v1304_v47, %v1275_v46 }
 0x119   :  { %v1331_v49 = vpop.f32.mrf.mxu1 }
 0x11a   :  { %v1332_v50 = vadd.f32 %v1331_v49, %v1305_v48 }
 0x11b   :  { %v1364_v51 = vpop.f32.mrf.mxu2  ;;  %v1389_v52 = vpop.f32.mrf.mxu3 }
 0x11c   :  { %v1365_v31 = vadd.f32 %v1364_v51, %v1332_v50 }
 0x11e   :  { %v1390_v36 = vadd.f32 %v1389_v52, %v1365_v31  ;;  %v1418_v37 = vpop.f32.mrf.mxu0 }
 0x120   :  { %1783 = vst [vmem:[#allocation9 + $0x5] ss:$8 sm:$0xf] %v1390_v36 }
 0x121   :  { %1784 = vst [vmem:[#allocation9 + $0x5] ss:$8 sm:$0xf0] %v1390_v36 }
 0x123   :  { %v1459_v53 = vpop.f32.mrf.mxu1 }
 0x124   :  { %v1460_v38 = vadd.f32 %v1459_v53, %v1418_v37 }
 0x125   :  { %v1489_v19 = vpop.f32.mrf.mxu2  ;;  %v1516_v24 = vpop.f32.mrf.mxu3 }
 0x126   :  { %v1490_v54 = vadd.f32 %v1489_v19, %v1460_v38 }
 0x128   :  { %v1517_v55 = vadd.f32 %v1516_v24, %v1490_v54  ;;  %v1549_v56 = vpop.f32.mrf.mxu0 }
 0x12a   :  { %v1550_v57 = vadd.f32 %v1549_v56, %v1517_v55 }
 0x12d   :  { %v1574_v58 = vpop.f32.mrf.mxu1 }
 0x12e   :  { %v1575_v59 = vadd.f32 %v1574_v58, %v1550_v57 }
 0x12f   :  { %v1603_v32 = vpop.f32.mrf.mxu2  ;;  %v1644_v43 = vpop.f32.mrf.mxu3 }
 0x130   :  { %1787 = vst [vmem:[#allocation9 + $0x6] ss:$8 sm:$0xf] %v1575_v59  ;;  %v1645_v25 = vadd.f32 %v1644_v43, %v1603_v32 }
 0x131   :  { %1788 = vst [vmem:[#allocation9 + $0x6] ss:$8 sm:$0xf0] %v1575_v59 }
 0x132   :  { %v1674_v35 = vpop.f32.mrf.mxu0 }
 0x133   :  { %v1675_v34 = vadd.f32 %v1674_v35, %v1645_v25 }
 0x135   :  { %v1701_v60 = vpop.f32.mrf.mxu1 }
 0x136   :  { %v1702_v61 = vadd.f32 %v1701_v60, %v1675_v34 }
 0x137   :  { %v1734_v62 = vpop.f32.mrf.mxu2 }
 0x138   :  { %v1735_v42 = vadd.f32 %v1734_v62, %v1702_v61 }
 0x13a   :  { %v1759_v63 = vpop.f32.mrf.mxu3 }
 0x13b   :  { %v1760_v0 = vadd.f32 %v1759_v63, %v1735_v42 }
 0x13d   :  { %1791 = vst [vmem:[#allocation9 + $0x7] ss:$8 sm:$0xf] %v1760_v0 }
 0x13e   :  { %1792 = vst [vmem:[#allocation9 + $0x7] ss:$8 sm:$0xf0] %v1760_v0 }
 0x13f   :  { %1805 = dma.vmem_to_hbm [thread:$0]  %s1798_s2, 1024, %s1800_s27, [#allocation4], %s2078_s28, %s2078_s28, %s2079_s29  }
 0x140   :  { %2068 = dma.done.wait [#allocation4], 1024  }
 0x141   :  { %2069 = vsyncadd [#allocation4], 4294966272 }
 0x142   :  { %1810 = vsyncpa [#allocation3], 1 }
 0x143   :  { %1811 = vsyncpa [#allocation7], 1 }
 0x144   :  { %1812 = vsyncpa [#allocation4], 1 }
 0x145   :  { %1813 = vsyncpa [#allocation5], 1 }

</bundles_post_ra>
